<compile_context>
chip_gen: v6e
topology: v6e:2x2x1
jax: 0.10.0
libtpu: 0.0.40
codegen_flags: <defaults>
</compile_context>

<pallas_src>
import functools

import jax
import jax.numpy as jnp
from jax.experimental import pallas as pl
from jax.experimental.pallas import tpu as pltpu


def _round_up(x, m):
    return ((x + m - 1) // m) * m


def _vmem_estimate(trows, in_cols, hid_cols, out_cols):
    """Rough per-step VMEM bytes (double-buffered streams + intermediates + weights)."""
    stream = 2 * trows * in_cols * 2 + 2 * trows * out_cols * 4   # phi bf16, out f32
    interm = trows * (hid_cols * (4 + 2) + out_cols * 4 * 4)      # h f32+bf16, y/y2/sumsq/inv
    weights = 2 * (in_cols * hid_cols * 2 + hid_cols * out_cols * 2
                   + out_cols * out_cols * 4 + (hid_cols + out_cols) * 4)
    return stream + interm + weights


def _dim_semantics(num_steps):
    """CORE_PARALLEL on v7x (actually shards across the 2 TCs); 'parallel' elsewhere."""
    kind = ""
    try:
        kind = jax.devices()[0].device_kind.lower()
    except Exception:
        pass
    if (("v7" in kind) or ("7x" in kind)) and num_steps >= 2 and num_steps % 2 == 0 \
            and hasattr(pltpu, "CORE_PARALLEL"):
        return (pltpu.CORE_PARALLEL,)
    return ("parallel",)


def emulator_kernel(x_ref, w1_ref, b1_ref, w2_ref, b2_ref, s_ref, o_ref):
    # x:  (T, pack*n_params) bf16     w1: (pack*n_params, pack*hidden) bf16
    # b1: (1, pack*hidden)   f32      w2: (pack*hidden, pack*emb)      bf16
    # b2: (1, pack*emb)      f32      S:  (pack*emb, pack*emb)         f32
    # o:  (T, pack*emb)      f32

    # fc1 + ReLU: bf16 operands, f32 MXU accumulation.
    h = jnp.dot(x_ref[...], w1_ref[...], preferred_element_type=jnp.float32)
    h = jnp.maximum(h + b1_ref[...], 0.0)

    # TODO(synk): Dropout(p=0.3) is identity in eval mode; a training-mode path
    # would use pltpu.prng_seed + pltpu.stateful_bernoulli.

    # fc2: bf16 operands, f32 accumulation.
    y = jnp.dot(h.astype(jnp.bfloat16), w2_ref[...],
                preferred_element_type=jnp.float32) + b2_ref[...]

    # Per-logical-row L2 normalization on the MXU: S is a 0/1 block-diagonal
    # segment matrix, so (y*y) @ S broadcasts each logical row's sum of squares
    # to every lane of its segment (no VALU masks / XLU cross-lane reductions).
    sumsq = jnp.dot(y * y, s_ref[...], preferred_element_type=jnp.float32)
    # rsqrt(max(sq, eps^2)) == 1 / max(||y||_2, eps), eps = 1e-12 (F.normalize);
    # rsqrt runs on the EUP slot.
    inv = jax.lax.rsqrt(jnp.maximum(sumsq, 1e-24))
    o_ref[...] = (y * inv).astype(o_ref.dtype)


def _fold_params(w1, b1, w2, b2, pack):
    """Block-diagonal fold so `pack` logical rows share one 128-lane physical row."""
    if pack == 1:
        w1f, w2f = w1, w2
        b1f, b2f = b1.reshape(1, -1), b2.reshape(1, -1)
    else:
        w1f = jax.scipy.linalg.block_diag(*([w1] * pack))
        w2f = jax.scipy.linalg.block_diag(*([w2] * pack))
        b1f = jnp.tile(b1, pack).reshape(1, -1)
        b2f = jnp.tile(b2, pack).reshape(1, -1)
    return (w1f.astype(jnp.bfloat16), b1f.astype(jnp.float32),
            w2f.astype(jnp.bfloat16), b2f.astype(jnp.float32))


@functools.partial(jax.jit, static_argnames=("tile_b", "out_dtype"))
def emulator_forward(phi, w1, b1, w2, b2, *, tile_b=8192, out_dtype=jnp.float32):
    """phi: (B, n_params) f32.  Weights in (in, out) layout (nn.Linear W^T)."""
    B, n_params = phi.shape
    hidden = w1.shape[1]
    emb = w2.shape[1]

    # Pack `pack` logical rows per 128-lane physical output row (lane-dense,
    # unmasked stores); fall back to pack=1 if emb does not divide 128.
    pack = 128 // emb if (emb < 128 and 128 % emb == 0) else 1
    in_cols, hid_cols, out_cols = pack * n_params, pack * hidden, pack * emb

    # Batch tile (original rows): multiple of 16*pack (bf16-friendly sublanes),
    # shrunk for tiny B, capped so estimated VMEM stays under ~40 MiB.
    step = 16 * pack
    tb = max(step, min(tile_b, _round_up(B, step)))
    tb = _round_up(tb, step)
    while tb > step and _vmem_estimate(tb // pack, in_cols, hid_cols, out_cols) > 40 * 2**20:
        tb = max(step, _round_up(tb // 2, step))

    Bp = _round_up(B, tb)
    phi_p = phi if Bp == B else jnp.pad(phi, ((0, Bp - B), (0, 0)))
    # Free row-major reshape: physical row r = [phi[pack*r], ..., phi[pack*r+pack-1]].
    phi_f = phi_p.reshape(Bp // pack, in_cols).astype(jnp.bfloat16)

    w1f, b1f, w2f, b2f = _fold_params(w1, b1, w2, b2, pack)
    # Block-diagonal 0/1 segment matrix for the in-kernel L2 reduction.
    s_mat = jax.scipy.linalg.block_diag(
        *([jnp.ones((emb, emb), jnp.float32)] * pack))

    rows = Bp // pack          # total physical (packed) rows
    trows = tb // pack         # physical rows per grid step
    num_steps = rows // trows

    est = _vmem_estimate(trows, in_cols, hid_cols, out_cols)
    vmem_limit = 48 * 2**20 if est > 12 * 2**20 else None

    out = pl.pallas_call(
        emulator_kernel,
        out_shape=jax.ShapeDtypeStruct((rows, out_cols), out_dtype),
        grid=(num_steps,),
        in_specs=[
            # phi streams over the batch grid (double-buffered by Pallas).
            pl.BlockSpec((trows, in_cols), lambda i: (i, 0)),
            # Weights/biases/segment matrix: constant index_map -> VMEM-resident.
            pl.BlockSpec((in_cols, hid_cols), lambda i: (0, 0)),
            pl.BlockSpec((1, hid_cols), lambda i: (0, 0)),
            pl.BlockSpec((hid_cols, out_cols), lambda i: (0, 0)),
            pl.BlockSpec((1, out_cols), lambda i: (0, 0)),
            pl.BlockSpec((out_cols, out_cols), lambda i: (0, 0)),
        ],
        out_specs=pl.BlockSpec((trows, out_cols), lambda i: (i, 0)),
        compiler_params=pltpu.CompilerParams(
            dimension_semantics=_dim_semantics(num_steps),
            vmem_limit_bytes=vmem_limit),
    )(phi_f, w1f, b1f, w2f, b2f, s_mat)

    # Free un-fold (identical bytes), then drop padded rows.
    return out.reshape(Bp, emb)[:B]


def reference(phi, w1, b1, w2, b2):
    h = jnp.maximum(phi @ w1 + b1, 0.0)
    y = h @ w2 + b2
    norm = jnp.sqrt(jnp.sum(y * y, axis=1, keepdims=True))
    return y / jnp.maximum(norm, 1e-12)


def init_params(key, n_params=10, hidden=128, embedding_dim=64):
    """Deterministic init matching nn.Linear shapes (stored as (in, out))."""
    k1, k2, k3, k4 = jax.random.split(key, 4)
    bound1 = 1.0 / jnp.sqrt(n_params)
    bound2 = 1.0 / jnp.sqrt(hidden)
    w1 = jax.random.uniform(k1, (n_params, hidden), jnp.float32, -bound1, bound1)
    b1 = jax.random.uniform(k2, (hidden,), jnp.float32, -bound1, bound1)
    w2 = jax.random.uniform(k3, (hidden, embedding_dim), jnp.float32, -bound2, bound2)
    b2 = jax.random.uniform(k4, (embedding_dim,), jnp.float32, -bound2, bound2)
    return w1, b1, w2, b2


if __name__ == "__main__":
    key = jax.random.PRNGKey(0)
    k_in, k_par = jax.random.split(key)

    # B=10 deliberately exercises the padded-tail path (rounds up to 32 rows).
    B, N_PARAMS, HIDDEN, EMB = 10, 10, 128, 64
    phi = jax.random.normal(k_in, (B, N_PARAMS), dtype=jnp.float32)
    w1, b1, w2, b2 = init_params(k_par, N_PARAMS, HIDDEN, EMB)

    out = emulator_forward(phi, w1, b1, w2, b2)
    out = jax.block_until_ready(out)

    ref = reference(phi, w1, b1, w2, b2)
    norms = jnp.linalg.norm(out, axis=1)

    # Tolerances account for bf16 MXU operands (f32 accumulation) in the kernel.
    assert out.shape == (B, EMB)
    assert bool(jnp.all(jnp.isfinite(out)))
    assert bool(jnp.all(jnp.abs(norms - 1.0) < 3e-3))
    assert bool(jnp.max(jnp.abs(out - ref)) < 1e-2)

    print("KERNEL_OK")
</pallas_src>

<mosaic_0001>
module attributes {stable_mosaic.version = 11 : i64} {
  func.func @emulator_kernel(%arg0: i32, %arg1: memref<16x20xbf16, #tpu.memory_space<vmem>>, %arg2: memref<20x256xbf16, #tpu.memory_space<vmem>>, %arg3: memref<1x256xf32, #tpu.memory_space<vmem>>, %arg4: memref<256x128xbf16, #tpu.memory_space<vmem>>, %arg5: memref<1x128xf32, #tpu.memory_space<vmem>>, %arg6: memref<128x128xf32, #tpu.memory_space<vmem>>, %arg7: memref<16x128xf32, #tpu.memory_space<vmem>>) attributes {dimension_semantics = [#tpu.dimension_semantics<parallel>], iteration_bounds = array<i64: 1>, scalar_prefetch = 0 : i64, scratch_operands = 0 : i64, tpu.core_type = #tpu.core_type<tc>, window_params = [{transform_indices = @transform_0, window_bounds = array<i64: 16, 20>}, {pipeline_mode = #tpu.pipeline_mode<synchronous>, transform_indices = @transform_1, window_bounds = array<i64: 20, 256>}, {pipeline_mode = #tpu.pipeline_mode<synchronous>, transform_indices = @transform_2, window_bounds = array<i64: 1, 256>}, {pipeline_mode = #tpu.pipeline_mode<synchronous>, transform_indices = @transform_3, window_bounds = array<i64: 256, 128>}, {pipeline_mode = #tpu.pipeline_mode<synchronous>, transform_indices = @transform_4, window_bounds = array<i64: 1, 128>}, {pipeline_mode = #tpu.pipeline_mode<synchronous>, transform_indices = @transform_5, window_bounds = array<i64: 128, 128>}, {transform_indices = @transform_6, window_bounds = array<i64: 16, 128>}]} {
    %c0 = arith.constant 0 : index
    %c0_0 = arith.constant 0 : index
    %0 = vector.load %arg1[%c0, %c0_0] : memref<16x20xbf16, #tpu.memory_space<vmem>>, vector<16x20xbf16>
    %c0_1 = arith.constant 0 : index
    %c0_2 = arith.constant 0 : index
    %1 = vector.load %arg2[%c0_1, %c0_2] : memref<20x256xbf16, #tpu.memory_space<vmem>>, vector<20x256xbf16>
    %cst = arith.constant dense<0.000000e+00> : vector<16x256xf32>
    %2 = tpu.matmul %0, %1, %cst {dimension_numbers = #tpu.dot_dimension_numbers<[1], [0], [0], [1], [0, 0, 1, 1], [], []>} : vector<16x20xbf16>, vector<20x256xbf16>, vector<16x256xf32> -> vector<16x256xf32>
    %c0_3 = arith.constant 0 : index
    %c0_4 = arith.constant 0 : index
    %3 = vector.load %arg3[%c0_3, %c0_4] : memref<1x256xf32, #tpu.memory_space<vmem>>, vector<1x256xf32>
    %4 = vector.broadcast %3 : vector<1x256xf32> to vector<16x256xf32>
    %5 = arith.addf %2, %4 : vector<16x256xf32>
    %cst_5 = arith.constant 0.000000e+00 : f32
    %6 = vector.broadcast %cst_5 : f32 to vector<16x256xf32>
    %7 = arith.maximumf %5, %6 : vector<16x256xf32>
    %8 = arith.truncf %7 : vector<16x256xf32> to vector<16x256xbf16>
    %c0_6 = arith.constant 0 : index
    %c0_7 = arith.constant 0 : index
    %9 = vector.load %arg4[%c0_6, %c0_7] : memref<256x128xbf16, #tpu.memory_space<vmem>>, vector<256x128xbf16>
    %cst_8 = arith.constant dense<0.000000e+00> : vector<16x128xf32>
    %10 = tpu.matmul %8, %9, %cst_8 {dimension_numbers = #tpu.dot_dimension_numbers<[1], [0], [0], [1], [0, 0, 1, 1], [], []>} : vector<16x256xbf16>, vector<256x128xbf16>, vector<16x128xf32> -> vector<16x128xf32>
    %c0_9 = arith.constant 0 : index
    %c0_10 = arith.constant 0 : index
    %11 = vector.load %arg5[%c0_9, %c0_10] : memref<1x128xf32, #tpu.memory_space<vmem>>, vector<1x128xf32>
    %12 = vector.broadcast %11 : vector<1x128xf32> to vector<16x128xf32>
    %13 = arith.addf %10, %12 : vector<16x128xf32>
    %14 = arith.mulf %13, %13 : vector<16x128xf32>
    %c0_11 = arith.constant 0 : index
    %c0_12 = arith.constant 0 : index
    %15 = vector.load %arg6[%c0_11, %c0_12] : memref<128x128xf32, #tpu.memory_space<vmem>>, vector<128x128xf32>
    %cst_13 = arith.constant dense<0.000000e+00> : vector<16x128xf32>
    %16 = tpu.matmul %14, %15, %cst_13 {dimension_numbers = #tpu.dot_dimension_numbers<[1], [0], [0], [1], [0, 0, 1, 1], [], []>} : vector<16x128xf32>, vector<128x128xf32>, vector<16x128xf32> -> vector<16x128xf32>
    %cst_14 = arith.constant 1.000000e-24 : f32
    %17 = vector.broadcast %cst_14 : f32 to vector<16x128xf32>
    %18 = arith.maximumf %16, %17 : vector<16x128xf32>
    %19 = math.rsqrt %18 : vector<16x128xf32>
    %20 = arith.mulf %13, %19 : vector<16x128xf32>
    %c0_15 = arith.constant 0 : index
    %c0_16 = arith.constant 0 : index
    %21 = vector.load %arg7[%c0_15, %c0_16] : memref<16x128xf32, #tpu.memory_space<vmem>>, vector<16x128xf32>
    tpu.vector_store %arg7[%c0_15, %c0_16], %20 {strides = array<i32>} : memref<16x128xf32, #tpu.memory_space<vmem>>, vector<16x128xf32>,
    return
  }
  func.func @transform_0(%arg0: i32) -> (i32, i32) {
    %c0_i32 = arith.constant 0 : i32
    %c0_i32_0 = arith.constant 0 : i32
    return %arg0, %c0_i32 : i32, i32
  }
  func.func @transform_1(%arg0: i32) -> (i32, i32) {
    %c0_i32 = arith.constant 0 : i32
    %c0_i32_0 = arith.constant 0 : i32
    %c0_i32_1 = arith.constant 0 : i32
    return %c0_i32, %c0_i32_0 : i32, i32
  }
  func.func @transform_2(%arg0: i32) -> (i32, i32) {
    %c0_i32 = arith.constant 0 : i32
    %c0_i32_0 = arith.constant 0 : i32
    %c0_i32_1 = arith.constant 0 : i32
    return %c0_i32, %c0_i32_0 : i32, i32
  }
  func.func @transform_3(%arg0: i32) -> (i32, i32) {
    %c0_i32 = arith.constant 0 : i32
    %c0_i32_0 = arith.constant 0 : i32
    %c0_i32_1 = arith.constant 0 : i32
    return %c0_i32, %c0_i32_0 : i32, i32
  }
  func.func @transform_4(%arg0: i32) -> (i32, i32) {
    %c0_i32 = arith.constant 0 : i32
    %c0_i32_0 = arith.constant 0 : i32
    %c0_i32_1 = arith.constant 0 : i32
    return %c0_i32, %c0_i32_0 : i32, i32
  }
  func.func @transform_5(%arg0: i32) -> (i32, i32) {
    %c0_i32 = arith.constant 0 : i32
    %c0_i32_0 = arith.constant 0 : i32
    %c0_i32_1 = arith.constant 0 : i32
    return %c0_i32, %c0_i32_0 : i32, i32
  }
  func.func @transform_6(%arg0: i32) -> (i32, i32) {
    %c0_i32 = arith.constant 0 : i32
    %c0_i32_0 = arith.constant 0 : i32
    return %arg0, %c0_i32 : i32, i32
  }
}

</mosaic_0001>

<bundles_post_ra>
// kernel: tile.18
= control target key start
LH: loop header
LB: loop body
LE: loop exit
PB: predicated region body
PF: predicated region fallthrough
CT: control target
= control target key end

     0   :  { %s22_s0 = inlined_call_operand.vmem [shape: f32[64], index: 0, kind: input, shape index: {}]   ;;  %s23_s1 = inlined_call_operand.vmem [shape: f32[2,64], index: 1, kind: output, shape index: {}]  }
   0x1   :  { %v4_v0 = vld [vmem:[%s22_s0] ss:$0 sm:$0xff] }
   0x2   :  { %5 = vst [vmem:[%s23_s1] sm:$0x3] %v4_v0 }

// kernel: tile.19
= control target key start
LH: loop header
LB: loop body
LE: loop exit
PB: predicated region body
PF: predicated region fallthrough
CT: control target
= control target key end

     0   :  { %vm8_vm0 = vcmask 523264   ;;  %vm14_vm1 = vcmask 1048064   ;;  %s42_s0 = inlined_call_operand.vmem [shape: f32[2,64], index: 0, kind: input, shape index: {}]   ;;  %s43_s1 = inlined_call_operand.vmem [shape: f32[1,128], index: 1, kind: output, shape index: {}]  }
   0x1   :  { %v5_v0 = vld [vmem:[%s42_s0] sm:$0x3]  ;;  %s25_s0 = smov 64  }
   0x2   :  { %6 = vst [vmem:[#allocation1] sm:$0x3] %v5_v0 }
   0x9   :  { %v11_v1 = vld [vmem:[#allocation1 + $0x1] sm:$0x1]   ;;  %v7_v2 = vld [vmem:[#allocation1] sm:$0x1]  }
   0xa   :  { %12 = vrot.lane.b32.xlu0 %v11_v1, %s25_s0  ;;  %9 = vst.msk [vmem:[#allocation0] sm:$0x1] %vm8_vm0, %v7_v2  }
  0x7c   :  { %v13_v3 = vpop.permute.xlu0 %12  }
  0x7d   :  { %15 = vst.msk [vmem:[#allocation0] sm:$0x1] %vm14_vm1, %v13_v3  }
  0x84   :  { %v20_v4 = vld [vmem:[#allocation0] sm:$0x1] }
  0x85   :  { %23 = vst [vmem:[%s43_s1] sm:$0x1] %v20_v4 }

// kernel: tile.13
= control target key start
LH: loop header
LB: loop body
LE: loop exit
PB: predicated region body
PF: predicated region fallthrough
CT: control target
= control target key end

     0   :  { %s22_s0 = inlined_call_operand.vmem [shape: f32[128], index: 0, kind: input, shape index: {}]   ;;  %s23_s1 = inlined_call_operand.vmem [shape: f32[2,128], index: 1, kind: output, shape index: {}]  }
   0x1   :  { %v4_v0 = vld [vmem:[%s22_s0] ss:$0 sm:$0xff] }
   0x2   :  { %5 = vst [vmem:[%s23_s1] sm:$0x3] %v4_v0 }

// kernel: emulator_forward.1
= control target key start
LH: loop header
LB: loop body
LE: loop exit
PB: predicated region body
PF: predicated region fallthrough
CT: control target
= control target key end

     0   :  { %vm65_vm0 = vcmask 1041408   ;;  %v528_v1 = vmov 0   ;;  %vm61_vm1 = vcmask 162816   ;;  %v31_v34 = vlaneseq  ;;  %s684_s1 = inlined_call_operand.vmem [shape: bf16[20,256], index: 1, kind: input, shape index: {}]   ;;  %s685_s0 = inlined_call_operand.vmem [shape: bf16[16,20], index: 0, kind: input, shape index: {}]   ;;  %s686_s3 = inlined_call_operand.vmem [shape: bf16[256,128], index: 3, kind: input, shape index: {}]   ;;  %s687_s5 = inlined_call_operand.vmem [shape: f32[128,128], index: 5, kind: input, shape index: {}]   ;;  %s688_s2 = inlined_call_operand.vmem [shape: f32[1,256], index: 2, kind: input, shape index: {}]   ;;  %s689_s4 = inlined_call_operand.vmem [shape: f32[1,128], index: 4, kind: input, shape index: {}]   ;;  %s690_s6 = inlined_call_operand.vmem [shape: f32[16,128], index: 6, kind: output, shape index: {}]  }
   0x1   :  { %v28_v0 = vld [vmem:[%s684_s1 + $0x10] sm:$0x33]  ;;  %104 = vmatprep.mubr.bf16.mxu0 %v528_v1  ;;  %v504_v4 = vld [vmem:[%s684_s1 + $0x4] ss:$8 sps:$4 sm:$0xff]   ;;  %v506_v5 = vld [vmem:[%s684_s1] ss:$8 sps:$4 sm:$0xff]  }
   0x2   :  { %v406_v2 = vcombine.high %v28_v0, %v28_v0  ;;  %v405_v3 = vcombine.low %v28_v0, %v28_v0  ;;  %v508_v7 = vld [vmem:[%s686_s3 + $0x78] sm:$0xff]   ;;  %v507_v9 = vld [vmem:[%s685_s0] sm:$0xff]   ;;  %v510_v10 = vld [vmem:[%s686_s3 + $0x70] sm:$0xff]   ;;  %v32_v35 = vshrl.u32 %v31_v34, 7 }
   0x3   :  { %v509_v8 = vld [vmem:[%s686_s3 + $0x38] sm:$0xff]   ;;  %426 = vmatprep.subr.bf16.mxu1 %v508_v7  ;;  %v511_v11 = vld [vmem:[%s686_s3 + $0x30] sm:$0xff]   ;;  %v512_v12 = vld [vmem:[%s686_s3 + $0x68] sm:$0xff]  }
   0x4   :  { %407 = vmatprep.subr.msk.bf16.mxu0 %vm65_vm0, %v406_v2  ;;  %v67_v6 = vsel %vm65_vm0, %v405_v3, 0  ;;  %427 = vmatpush3.bf16.msra.mxu1 %v509_v8  ;;  %v513_v13 = vld [vmem:[%s686_s3 + $0x28] sm:$0xff]   ;;  %v514_v14 = vld [vmem:[%s686_s3 + $0x60] sm:$0xff]   ;;  %v516_v16 = vld [vmem:[%s686_s3 + $0x58] sm:$0xff]   ;;  %v37_v36 = vsub.s32 1, %v32_v35  ;;  %v33_v37 = vsub.s32 0, %v32_v35 }
   0x5   :  { %85 = vmatpush1.bf16.msra.mxu0 %v67_v6  ;;  %428 = vmatprep.subr.bf16.mxu1 %v510_v10  ;;  %v515_v15 = vld [vmem:[%s686_s3 + $0x20] sm:$0xff]   ;;  %v517_v17 = vld [vmem:[%s686_s3 + $0x18] sm:$0xff]   ;;  %v518_v18 = vld [vmem:[%s686_s3 + $0x50] sm:$0xff]  }
   0x6   :  { %86 = vmatprep.subr.bf16.mxu0 %v504_v4  ;;  %v519_v19 = vld [vmem:[%s686_s3 + $0x10] sm:$0xff]   ;;  %v520_v20 = vld [vmem:[%s686_s3 + $0x48] sm:$0xff]   ;;  %v522_v22 = vld [vmem:[%s686_s3 + $0x40] sm:$0xff]  }
   0x7   :  { %v521_v21 = vld [vmem:[%s686_s3 + $0x8] sm:$0xff]   ;;  %v523_v23 = vld [vmem:[%s686_s3] sm:$0xff]   ;;  %v314_v24 = vld [vmem:[%s687_s5 + $0x78] sm:$0xff] }
   0x8   :  { %429 = vmatpush3.bf16.msra.mxu1 %v511_v11  ;;  %v313_v25 = vld [vmem:[%s687_s5 + $0x70] sm:$0xff]  ;;  %v312_v26 = vld [vmem:[%s687_s5 + $0x68] sm:$0xff]  ;;  %v311_v27 = vld [vmem:[%s687_s5 + $0x60] sm:$0xff] }
   0x9   :  { %87 = vmatpush1.bf16.msra.mxu0 %v506_v5  ;;  %430 = vmatprep.subr.bf16.mxu1 %v512_v12  ;;  %v310_v28 = vld [vmem:[%s687_s5 + $0x58] sm:$0xff]  ;;  %v309_v29 = vld [vmem:[%s687_s5 + $0x50] sm:$0xff]  ;;  %v308_v30 = vld [vmem:[%s687_s5 + $0x48] sm:$0xff] }
   0xa   :  { %466 = vmatprep.subr.mxu0 %v314_v24  ;;  %v307_v31 = vld [vmem:[%s687_s5 + $0x40] sm:$0xff]  ;;  %v306_v32 = vld [vmem:[%s687_s5 + $0x38] sm:$0xff]  ;;  %v305_v33 = vld [vmem:[%s687_s5 + $0x30] sm:$0xff] }
   0xb   :  { %v29_v38 = vld [vmem:[%s688_s2] sm:$0x3]  ;;  %v304_v55 = vld [vmem:[%s687_s5 + $0x28] sm:$0xff]  ;;  %v302_v57 = vld [vmem:[%s687_s5 + $0x18] sm:$0xff] }
   0xc   :  { %408 = vmatmul.mubr.msk.bf16.vlgmr.msra.gmra.mxu0 %vm61_vm1, %v507_v9  ;;  %431 = vmatpush3.bf16.msra.mxu1 %v513_v13  ;;  %v38_v40 = vrot.slane %v29_v38, %v37_v36  ;;  %v34_v41 = vrot.slane %v29_v38, %v33_v37  ;;  %v303_v56 = vld [vmem:[%s687_s5 + $0x20] sm:$0xff]  ;;  %v301_v58 = vld [vmem:[%s687_s5 + $0x10] sm:$0xff]  ;;  %v300_v59 = vld [vmem:[%s687_s5 + $0x8] sm:$0xff] }
   0xd   :  { %432 = vmatprep.subr.bf16.mxu1 %v514_v14  ;;  %467 = vmatpush3.msra.mxu0 %v314_v24  ;;  %v299_v60 = vld [vmem:[%s687_s5] sm:$0xff] }
   0xe   :  { %468 = vmatprep.subr.mxu0 %v313_v25  ;;  %v409_v62 = vld [vmem:[%s689_s4] ss:$0 sm:$0xff] }
   0xf   :  { %469 = vmatpush3.msra.mxu0 %v313_v25 }
  0x10   :  { %433 = vmatpush3.bf16.msra.mxu1 %v515_v15  ;;  %470 = vmatprep.subr.mxu0 %v312_v26 }
  0x11   :  { %434 = vmatprep.subr.bf16.mxu1 %v516_v16  ;;  %471 = vmatpush3.msra.mxu0 %v312_v26 }
  0x12   :  { %472 = vmatprep.subr.mxu0 %v311_v27 }
  0x13   :  { %473 = vmatpush3.msra.mxu0 %v311_v27 }
  0x14   :  { %435 = vmatpush3.bf16.msra.mxu1 %v517_v17  ;;  %474 = vmatprep.subr.mxu0 %v310_v28 }
  0x15   :  { %436 = vmatprep.subr.bf16.mxu1 %v518_v18  ;;  %475 = vmatpush3.msra.mxu0 %v310_v28 }
  0x16   :  { %476 = vmatprep.subr.mxu0 %v309_v29 }
  0x17   :  { %477 = vmatpush3.msra.mxu0 %v309_v29 }
  0x18   :  { %437 = vmatpush3.bf16.msra.mxu1 %v519_v19  ;;  %478 = vmatprep.subr.mxu0 %v308_v30 }
  0x19   :  { %438 = vmatprep.subr.bf16.mxu1 %v520_v20  ;;  %479 = vmatpush3.msra.mxu0 %v308_v30 }
  0x1a   :  { %480 = vmatprep.subr.mxu0 %v307_v31 }
  0x1b   :  { %481 = vmatpush3.msra.mxu0 %v307_v31 }
  0x1c   :  { %439 = vmatpush3.bf16.msra.mxu1 %v521_v21  ;;  %482 = vmatprep.subr.mxu0 %v306_v32 }
  0x1d   :  { %440 = vmatprep.subr.bf16.mxu1 %v522_v22  ;;  %483 = vmatpush3.msra.mxu0 %v306_v32 }
  0x1e   :  { %484 = vmatprep.subr.mxu0 %v305_v33 }
  0x1f   :  { %485 = vmatpush3.msra.mxu0 %v305_v33 }
  0x20   :  { %441 = vmatpush3.bf16.msra.mxu1 %v523_v23  ;;  %486 = vmatprep.subr.mxu0 %v304_v55 }
  0x21   :  { %487 = vmatpush3.msra.mxu0 %v304_v55 }
  0x22   :  { %488 = vmatprep.subr.mxu0 %v303_v56 }
  0x23   :  { %489 = vmatpush3.msra.mxu0 %v303_v56 }
  0x24   :  { %490 = vmatprep.subr.mxu0 %v302_v57 }
  0x25   :  { %491 = vmatpush3.msra.mxu0 %v302_v57 }
  0x26   :  { %492 = vmatprep.subr.mxu0 %v301_v58 }
  0x27   :  { %493 = vmatpush3.msra.mxu0 %v301_v58 }
  0x28   :  { %494 = vmatprep.subr.mxu0 %v300_v59 }
  0x29   :  { %495 = vmatpush3.msra.mxu0 %v300_v59 }
  0x2a   :  { %496 = vmatprep.subr.mxu0 %v299_v60 }
  0x2b   :  { %497 = vmatpush3.msra.mxu0 %v299_v60 }
  0xcc   :  { %v106_v39 = vpop.f32.mrf.mxu0 }
  0xcd   :  { %v107_v46 = vadd.f32 %v106_v39, %v34_v41 }
  0xce   :  { %v108_v42 = vpop.f32.mrf.mxu0 }
  0xcf   :  { %v109_v44 = vadd.f32 %v108_v42, %v38_v40  ;;  %v115_v52 = vmax.f32 %v107_v46, 0.0 }
  0xd0   :  { %v110_v43 = vpop.f32.mrf.mxu0 }
  0xd1   :  { %v111_v45 = vadd.f32 %v110_v43, %v34_v41  ;;  %v116_v50 = vmax.f32 %v109_v44, 0.0 }
  0xd2   :  { %v112_v47 = vpop.f32.mrf.mxu0 }
  0xd3   :  { %v113_v48 = vadd.f32 %v112_v47, %v38_v40  ;;  %v117_v49 = vmax.f32 %v111_v45, 0.0 }
  0xd5   :  { %v118_v51 = vmax.f32 %v113_v48, 0.0  ;;  %v119_v54 = vpack.c.bf16 %v117_v49, %v115_v52 }
  0xd7   :  { %v120_v53 = vpack.c.bf16 %v118_v51, %v116_v50 }
  0xd9   :  { %288 = vmatprep.mubr.bf16.mxu1 %v120_v53 }
  0xda   :  { %289 = vmatmul.mubr.bf16.vlgmr.msra.gmra.mxu1 %v119_v54 }
 0x19a   :  { %v442_v61 = vpop.f32.mrf.mxu1 }
 0x19c   :  { %v443_v63 = vpop.f32.mrf.mxu1 }
 0x19d   :  { %v444_v0 = vadd.f32 %v443_v63, %v442_v61 }
 0x19e   :  { %v445_v1 = vpop.f32.mrf.mxu1 }
 0x19f   :  { %v291_v2 = vadd.f32 %v444_v0, %v409_v62 }
 0x1a0   :  { %v446_v3 = vpop.f32.mrf.mxu1 }
 0x1a1   :  { %v447_v4 = vadd.f32 %v446_v3, %v445_v1  ;;  %v297_v5 = vmul.f32 %v291_v2, %v291_v2 }
 0x1a3   :  { %v294_v6 = vadd.f32 %v447_v4, %v409_v62  ;;  %498 = vmatprep.mubr.f32.mxu0 %v297_v5 }
 0x1a5   :  { %v298_v7 = vmul.f32 %v294_v6, %v294_v6 }
 0x1a7   :  { %499 = vmatmul.mubr.f32.vlgmr.msra.gmra.mxu0 %v298_v7 }
 0x267   :  { %v500_v8 = vpop.f32.mrf.mxu0 }
 0x268   :  { %v391_v9 = vmax.f32 %v500_v8, 1e-24 }
 0x269   :  { %v381_v10 = vpop.f32.mrf.mxu0 }
 0x26a   :  { %524 = vrsqrt.f32 %v391_v9  ;;  %v390_v11 = vmax.f32 %v381_v10, 1e-24 }
 0x26c   :  { %526 = vrsqrt.f32 %v390_v11 }
 0x277   :  { %v525_v12 = vpop.eup %524 }
 0x278   :  { %v395_v13 = vmul.f32 %v525_v12, %v294_v6 }
 0x279   :  { %v527_v14 = vpop.eup %526 }
 0x27a   :  { %397 = vst [vmem:[%s690_s6 + $0x8] sm:$0xff] %v395_v13  ;;  %v394_v15 = vmul.f32 %v527_v14, %v291_v2 }
 0x27c   :  { %396 = vst [vmem:[%s690_s6] sm:$0xff] %v394_v15 }

</bundles_post_ra>
